<compile_context>
chip_gen: v7x
topology: tpu7x:2x2x1
jax: 0.10.0
libtpu: 0.0.40
codegen_flags: <defaults>
</compile_context>

<pallas_src>
import functools

import jax
import jax.numpy as jnp
from jax.experimental import pallas as pl
from jax.experimental.pallas import tpu as pltpu


def block_kernel(x_ref,
                 ln1_g_ref, ln1_b_ref,
                 wqkv_ref, wproj_ref, bproj_ref,
                 ln2_g_ref, ln2_b_ref,
                 w1_ref, b1_ref, w2_ref, b2_ref,
                 o_ref,
                 *, n_head):
    x3 = x_ref[...].astype(jnp.float32)            # (Bb, T, C)
    Bb, T, C = x3.shape
    hs = C // n_head
    R = Bb * T
    x = x3.reshape(R, C)                           # fold batch rows -> dense rows

    def layernorm(v, g_ref, b_ref):
        mu = jnp.mean(v, axis=-1, keepdims=True)
        var = jnp.mean((v - mu) ** 2, axis=-1, keepdims=True)
        return (v - mu) * jax.lax.rsqrt(var + 1e-5) * g_ref[...] + b_ref[...]

    # ---- LayerNorm 1 (f32), single bf16 cast feeding the MXU ----
    h_bf = layernorm(x, ln1_g_ref, ln1_b_ref).astype(jnp.bfloat16)

    # ---- Fused QKV: one (R, C) x (C, 3C) MXU pass, f32 accumulation ----
    qkv = jnp.dot(h_bf, wqkv_ref[...], preferred_element_type=jnp.float32)
    q3 = qkv[:, 0 * C:1 * C].astype(jnp.bfloat16).reshape(Bb, T, C)
    k3 = qkv[:, 1 * C:2 * C].astype(jnp.bfloat16).reshape(Bb, T, C)
    v3 = qkv[:, 2 * C:3 * C].astype(jnp.bfloat16).reshape(Bb, T, C)

    # ---- Causal multi-head attention ----
    scale = C ** (-0.5)                            # reference scales by n_embd
    row = jax.lax.broadcasted_iota(jnp.int32, (T, T), 0)
    col = jax.lax.broadcasted_iota(jnp.int32, (T, T), 1)
    causal = (col <= row)[None, :, :]              # (1, T, T), hoisted out of the loop

    head_outs = []
    for hd in range(n_head):                       # static unroll (small n_head)
        lo = hd * hs
        qh = q3[:, :, lo:lo + hs]                  # (Bb, T, hs)
        kh = k3[:, :, lo:lo + hs]
        vh = v3[:, :, lo:lo + hs]
        s = jnp.einsum('bqd,bkd->bqk', qh, kh,
                       preferred_element_type=jnp.float32) * scale
        # diagonal is always unmasked, so a large finite negative == -inf here
        s = jnp.where(causal, s, -1e30)
        s = s - jnp.max(s, axis=-1, keepdims=True)
        p = jnp.exp(s)
        p = p * pl.reciprocal(jnp.sum(p, axis=-1, keepdims=True), approx=True)
        head_outs.append(
            jnp.einsum('bqk,bkd->bqd', p.astype(jnp.bfloat16), vh,
                       preferred_element_type=jnp.float32).astype(jnp.bfloat16))

    # Concat heads once (lane axis), then ONE full-width K=C projection matmul
    # (instead of n_head K=head_size matmuls + VPU accumulation).
    attn = jnp.concatenate(head_outs, axis=-1).reshape(R, C)
    sa = jnp.dot(attn, wproj_ref[...], preferred_element_type=jnp.float32)

    x = x + sa + bproj_ref[...]                    # residual 1 (f32)

    # ---- LayerNorm 2 + FeedForward (Linear -> ReLU -> Linear) ----
    h2 = layernorm(x, ln2_g_ref, ln2_b_ref).astype(jnp.bfloat16)
    ff = jnp.dot(h2, w1_ref[...], preferred_element_type=jnp.float32) + b1_ref[...]
    ff = jnp.maximum(ff, 0.0).astype(jnp.bfloat16)
    ff = jnp.dot(ff, w2_ref[...], preferred_element_type=jnp.float32) + b2_ref[...]

    o_ref[...] = (x + ff).reshape(Bb, T, C).astype(o_ref.dtype)   # residual 2


def _const_spec(shape):
    """BlockSpec for a weight/bias whose block index never changes.

    Single-buffer it (pl.Buffered(1)) so resident weights are not duplicated by
    the default double-buffering; fall back gracefully on older jax versions.
    """
    nd = len(shape)
    index_map = lambda i, _nd=nd: (0,) * _nd
    try:
        return pl.BlockSpec(shape, index_map, pipeline_mode=pl.Buffered(1))
    except TypeError:
        return pl.BlockSpec(shape, index_map)


def _pick_vmem_limit():
    """Raise the scoped-VMEM limit above the 16/32 MiB defaults, clamped below
    physical capacity (128 MiB v5e/v6e, 64 MiB per-core v7x)."""
    try:
        cap = pltpu.get_tpu_info().vmem_capacity_bytes
        return int(min(112 * 1024 * 1024, cap * 7 // 8))
    except Exception:
        return 48 * 1024 * 1024   # safe on every generation


def prepare_block_params(params):
    """One-time conversion of PyTorch-layout f32 params into the kernel's
    (in, out) bf16 layout.  Call at init time, NOT per forward call."""
    bf = jnp.bfloat16
    n_head, head_size, n_embd = params["wq"].shape
    C = n_embd
    # wq/wk/wv: (H, hs, C) -> (C_in, C_out) with head hd occupying columns
    # hd*hs : (hd+1)*hs (matches the reference concat order), then fused (C,3C).
    wq_t = params["wq"].reshape(C, C).T
    wk_t = params["wk"].reshape(C, C).T
    wv_t = params["wv"].reshape(C, C).T
    wqkv = jnp.concatenate([wq_t, wk_t, wv_t], axis=1).astype(bf)   # (C, 3C)
    return {
        "n_head": int(n_head),
        "ln1_g": params["ln1_g"], "ln1_b": params["ln1_b"],
        "wqkv": wqkv,
        "wproj": params["wproj"].T.astype(bf),                      # (C, C) in,out
        "bproj": params["bproj"],
        "ln2_g": params["ln2_g"], "ln2_b": params["ln2_b"],
        "w1": params["w1"].T.astype(bf), "b1": params["b1"],        # (C, 4C)
        "w2": params["w2"].T.astype(bf), "b2": params["b2"],        # (4C, C)
    }


def transformer_block(x, kparams, *, block_b=None):
    """x: (B, T, C) float32. kparams: output of prepare_block_params."""
    B, T, C = x.shape
    n_head = kparams["n_head"]

    # Fold batch rows per grid step so the row dimension is sublane-dense:
    # target ~512 rows/step (128 MiB VMEM on v5e/v6e has the headroom), but keep
    # the grid length >= 2 so the "parallel" batch axis can split across the two
    # TensorCores of a v7x chip.
    if block_b is None:
        block_b = max(1, min(B, max(1, 512 // max(T, 1))))
        while B % block_b:
            block_b -= 1
        if B >= 2:
            while B // block_b < 2:
                block_b -= 1
                while B % block_b:
                    block_b -= 1
    grid = (B // block_b,)

    param_order = ["ln1_g", "ln1_b", "wqkv", "wproj", "bproj",
                   "ln2_g", "ln2_b", "w1", "b1", "w2", "b2"]
    param_list = [kparams[k] for k in param_order]

    in_specs = [pl.BlockSpec((block_b, T, C), lambda i: (i, 0, 0))] + \
               [_const_spec(p.shape) for p in param_list]

    kernel = functools.partial(block_kernel, n_head=n_head)
    return pl.pallas_call(
        kernel,
        out_shape=jax.ShapeDtypeStruct((B, T, C), x.dtype),
        grid=grid,
        in_specs=in_specs,
        out_specs=pl.BlockSpec((block_b, T, C), lambda i: (i, 0, 0)),
        compiler_params=pltpu.CompilerParams(
            dimension_semantics=("parallel",),
            vmem_limit_bytes=_pick_vmem_limit()),
    )(x, *param_list)


def init_params(key, n_embd, n_head):
    head_size = n_embd // n_head
    ks = jax.random.split(key, 8)
    s = 0.02
    return {
        "ln1_g": jnp.ones((1, n_embd), jnp.float32),
        "ln1_b": jnp.zeros((1, n_embd), jnp.float32),
        "wq": s * jax.random.normal(ks[0], (n_head, head_size, n_embd), jnp.float32),
        "wk": s * jax.random.normal(ks[1], (n_head, head_size, n_embd), jnp.float32),
        "wv": s * jax.random.normal(ks[2], (n_head, head_size, n_embd), jnp.float32),
        "wproj": s * jax.random.normal(ks[3], (n_embd, n_embd), jnp.float32),
        "bproj": s * jax.random.normal(ks[4], (1, n_embd), jnp.float32),
        "ln2_g": jnp.ones((1, n_embd), jnp.float32),
        "ln2_b": jnp.zeros((1, n_embd), jnp.float32),
        "w1": s * jax.random.normal(ks[5], (4 * n_embd, n_embd), jnp.float32),
        "b1": s * jax.random.normal(ks[6], (1, 4 * n_embd), jnp.float32),
        "w2": s * jax.random.normal(ks[7], (n_embd, 4 * n_embd), jnp.float32),
        "b2": jnp.zeros((1, n_embd), jnp.float32),
    }


def reference_block(x, p):
    """Pure-JAX f32 reference mirroring the PyTorch module (dropout=0 / eval)."""
    B, T, C = x.shape

    def ln(v, g, b):
        mu = jnp.mean(v, axis=-1, keepdims=True)
        var = jnp.mean((v - mu) ** 2, axis=-1, keepdims=True)
        return (v - mu) * jax.lax.rsqrt(var + 1e-5) * g + b

    h = ln(x, p["ln1_g"], p["ln1_b"])
    mask = jnp.tril(jnp.ones((T, T), bool))
    outs = []
    for hd in range(p["wq"].shape[0]):
        q = h @ p["wq"][hd].T
        k = h @ p["wk"][hd].T
        v = h @ p["wv"][hd].T
        wei = (q @ jnp.swapaxes(k, -1, -2)) * C ** (-0.5)
        wei = jnp.where(mask, wei, -jnp.inf)
        wei = jax.nn.softmax(wei, axis=-1)
        outs.append(wei @ v)
    sa = jnp.concatenate(outs, axis=-1) @ p["wproj"].T + p["bproj"]
    x = x + sa
    h2 = ln(x, p["ln2_g"], p["ln2_b"])
    ff = jnp.maximum(h2 @ p["w1"].T + p["b1"], 0.0) @ p["w2"].T + p["b2"]
    return x + ff


if __name__ == "__main__":
    B, T, n_embd, n_head = 2, 8, 32, 4   # block_size == T
    key = jax.random.PRNGKey(0)
    kx, kp = jax.random.split(key)
    x = jax.random.normal(kx, (B, T, n_embd), jnp.float32)
    params = init_params(kp, n_embd, n_head)

    kparams = prepare_block_params(params)   # one-time weight layout conversion

    out = transformer_block(x, kparams)
    out = jax.block_until_ready(out)

    ref = reference_block(x, params)
    assert out.shape == (B, T, n_embd)
    # bf16 matmul inputs with f32 accumulation -> small, bounded deviation vs f32 ref
    assert jnp.allclose(out, ref, atol=1e-2, rtol=1e-2), "mismatch vs reference"
    print("KERNEL_OK")
</pallas_src>

<mosaic_0001>
module attributes {stable_mosaic.version = 11 : i64} {
  func.func @block_kernel(%arg0: i32, %arg1: memref<1x8x32xf32, #tpu.memory_space<vmem>>, %arg2: memref<1x32xf32, #tpu.memory_space<vmem>>, %arg3: memref<1x32xf32, #tpu.memory_space<vmem>>, %arg4: memref<32x96xbf16, #tpu.memory_space<vmem>>, %arg5: memref<32x32xbf16, #tpu.memory_space<vmem>>, %arg6: memref<1x32xf32, #tpu.memory_space<vmem>>, %arg7: memref<1x32xf32, #tpu.memory_space<vmem>>, %arg8: memref<1x32xf32, #tpu.memory_space<vmem>>, %arg9: memref<32x128xbf16, #tpu.memory_space<vmem>>, %arg10: memref<1x128xf32, #tpu.memory_space<vmem>>, %arg11: memref<128x32xbf16, #tpu.memory_space<vmem>>, %arg12: memref<1x32xf32, #tpu.memory_space<vmem>>, %arg13: memref<1x8x32xf32, #tpu.memory_space<vmem>>) attributes {dimension_semantics = [#tpu.dimension_semantics<parallel>], iteration_bounds = array<i64: 2>, scalar_prefetch = 0 : i64, scratch_operands = 0 : i64, tpu.core_type = #tpu.core_type<tc>, window_params = [{transform_indices = @transform_0, window_bounds = array<i64: 1, 8, 32>}, {pipeline_mode = #tpu.pipeline_mode<synchronous>, transform_indices = @transform_1, window_bounds = array<i64: 1, 32>}, {pipeline_mode = #tpu.pipeline_mode<synchronous>, transform_indices = @transform_2, window_bounds = array<i64: 1, 32>}, {pipeline_mode = #tpu.pipeline_mode<synchronous>, transform_indices = @transform_3, window_bounds = array<i64: 32, 96>}, {pipeline_mode = #tpu.pipeline_mode<synchronous>, transform_indices = @transform_4, window_bounds = array<i64: 32, 32>}, {pipeline_mode = #tpu.pipeline_mode<synchronous>, transform_indices = @transform_5, window_bounds = array<i64: 1, 32>}, {pipeline_mode = #tpu.pipeline_mode<synchronous>, transform_indices = @transform_6, window_bounds = array<i64: 1, 32>}, {pipeline_mode = #tpu.pipeline_mode<synchronous>, transform_indices = @transform_7, window_bounds = array<i64: 1, 32>}, {pipeline_mode = #tpu.pipeline_mode<synchronous>, transform_indices = @transform_8, window_bounds = array<i64: 32, 128>}, {pipeline_mode = #tpu.pipeline_mode<synchronous>, transform_indices = @transform_9, window_bounds = array<i64: 1, 128>}, {pipeline_mode = #tpu.pipeline_mode<synchronous>, transform_indices = @transform_10, window_bounds = array<i64: 128, 32>}, {pipeline_mode = #tpu.pipeline_mode<synchronous>, transform_indices = @transform_11, window_bounds = array<i64: 1, 32>}, {transform_indices = @transform_12, window_bounds = array<i64: 1, 8, 32>}]} {
    %c0 = arith.constant 0 : index
    %c0_0 = arith.constant 0 : index
    %c0_1 = arith.constant 0 : index
    %0 = vector.load %arg1[%c0, %c0_0, %c0_1] : memref<1x8x32xf32, #tpu.memory_space<vmem>>, vector<1x8x32xf32>
    %1 = vector.shape_cast %0 : vector<1x8x32xf32> to vector<8x32xf32>
    %cst = arith.constant dense<0.000000e+00> : vector<8xf32>
    %2 = vector.multi_reduction <add>, %1, %cst [1] : vector<8x32xf32> to vector<8xf32>
    %3 = vector.shape_cast %2 : vector<8xf32> to vector<8x1xf32>
    %cst_2 = arith.constant 3.200000e+01 : f32
    %4 = vector.broadcast %cst_2 : f32 to vector<8x1xf32>
    %5 = arith.divf %3, %4 : vector<8x1xf32>
    %6 = vector.broadcast %5 : vector<8x1xf32> to vector<8x32xf32>
    %7 = arith.subf %1, %6 : vector<8x32xf32>
    %8 = arith.mulf %7, %7 : vector<8x32xf32>
    %cst_3 = arith.constant dense<0.000000e+00> : vector<8xf32>
    %9 = vector.multi_reduction <add>, %8, %cst_3 [1] : vector<8x32xf32> to vector<8xf32>
    %10 = vector.shape_cast %9 : vector<8xf32> to vector<8x1xf32>
    %cst_4 = arith.constant 3.200000e+01 : f32
    %11 = vector.broadcast %cst_4 : f32 to vector<8x1xf32>
    %12 = arith.divf %10, %11 : vector<8x1xf32>
    %13 = vector.broadcast %5 : vector<8x1xf32> to vector<8x32xf32>
    %14 = arith.subf %1, %13 : vector<8x32xf32>
    %cst_5 = arith.constant 9.99999974E-6 : f32
    %15 = vector.broadcast %cst_5 : f32 to vector<8x1xf32>
    %16 = arith.addf %12, %15 : vector<8x1xf32>
    %17 = math.rsqrt %16 : vector<8x1xf32>
    %18 = vector.broadcast %17 : vector<8x1xf32> to vector<8x32xf32>
    %19 = arith.mulf %14, %18 : vector<8x32xf32>
    %c0_6 = arith.constant 0 : index
    %c0_7 = arith.constant 0 : index
    %20 = vector.load %arg2[%c0_6, %c0_7] : memref<1x32xf32, #tpu.memory_space<vmem>>, vector<1x32xf32>
    %21 = vector.broadcast %20 : vector<1x32xf32> to vector<8x32xf32>
    %22 = arith.mulf %19, %21 : vector<8x32xf32>
    %c0_8 = arith.constant 0 : index
    %c0_9 = arith.constant 0 : index
    %23 = vector.load %arg3[%c0_8, %c0_9] : memref<1x32xf32, #tpu.memory_space<vmem>>, vector<1x32xf32>
    %24 = vector.broadcast %23 : vector<1x32xf32> to vector<8x32xf32>
    %25 = arith.addf %22, %24 : vector<8x32xf32>
    %26 = arith.truncf %25 : vector<8x32xf32> to vector<8x32xbf16>
    %c0_10 = arith.constant 0 : index
    %c0_11 = arith.constant 0 : index
    %27 = vector.load %arg4[%c0_10, %c0_11] : memref<32x96xbf16, #tpu.memory_space<vmem>>, vector<32x96xbf16>
    %cst_12 = arith.constant dense<0.000000e+00> : vector<8x96xf32>
    %28 = tpu.matmul %26, %27, %cst_12 {dimension_numbers = #tpu.dot_dimension_numbers<[1], [0], [0], [1], [0, 0, 1, 1], [], []>} : vector<8x32xbf16>, vector<32x96xbf16>, vector<8x96xf32> -> vector<8x96xf32>
    %29 = vector.extract_strided_slice %28 {offsets = [0, 0], sizes = [8, 32], strides = [1, 1]} : vector<8x96xf32> to vector<8x32xf32>
    %30 = arith.truncf %29 : vector<8x32xf32> to vector<8x32xbf16>
    %31 = vector.shape_cast %30 : vector<8x32xbf16> to vector<1x8x32xbf16>
    %32 = vector.extract_strided_slice %28 {offsets = [0, 32], sizes = [8, 32], strides = [1, 1]} : vector<8x96xf32> to vector<8x32xf32>
    %33 = arith.truncf %32 : vector<8x32xf32> to vector<8x32xbf16>
    %34 = vector.shape_cast %33 : vector<8x32xbf16> to vector<1x8x32xbf16>
    %35 = vector.extract_strided_slice %28 {offsets = [0, 64], sizes = [8, 32], strides = [1, 1]} : vector<8x96xf32> to vector<8x32xf32>
    %36 = arith.truncf %35 : vector<8x32xf32> to vector<8x32xbf16>
    %37 = vector.shape_cast %36 : vector<8x32xbf16> to vector<1x8x32xbf16>
    %38 = tpu.iota {dimensions = array<i32: 0>} : vector<8x8xi32>
    %39 = tpu.iota {dimensions = array<i32: 1>} : vector<8x8xi32>
    %40 = arith.cmpi sle, %39, %38 : vector<8x8xi32>
    %41 = vector.shape_cast %40 : vector<8x8xi1> to vector<1x8x8xi1>
    %42 = vector.extract_strided_slice %31 {offsets = [0, 0, 0], sizes = [1, 8, 8], strides = [1, 1, 1]} : vector<1x8x32xbf16> to vector<1x8x8xbf16>
    %43 = vector.extract_strided_slice %34 {offsets = [0, 0, 0], sizes = [1, 8, 8], strides = [1, 1, 1]} : vector<1x8x32xbf16> to vector<1x8x8xbf16>
    %44 = vector.extract_strided_slice %37 {offsets = [0, 0, 0], sizes = [1, 8, 8], strides = [1, 1, 1]} : vector<1x8x32xbf16> to vector<1x8x8xbf16>
    "tpu.trace_start"() <{level = 10 : i32, message = "bqd,bkd->bqk"}> : () -> ()
    %cst_13 = arith.constant dense<0.000000e+00> : vector<1x8x8xf32>
    %45 = tpu.matmul %42, %43, %cst_13 {dimension_numbers = #tpu.dot_dimension_numbers<[2], [2], [1], [1], [0, 0, 0, 1, 1, 1], [0], [0]>} : vector<1x8x8xbf16>, vector<1x8x8xbf16>, vector<1x8x8xf32> -> vector<1x8x8xf32>
    "tpu.trace_stop"() : () -> ()
    %cst_14 = arith.constant 0.176776692 : f32
    %46 = vector.broadcast %cst_14 : f32 to vector<1x8x8xf32>
    %47 = arith.mulf %45, %46 : vector<1x8x8xf32>
    %cst_15 = arith.constant -1.000000e+30 : f32
    %48 = vector.broadcast %cst_15 : f32 to vector<1x8x8xf32>
    %49 = arith.select %41, %47, %48 : vector<1x8x8xi1>, vector<1x8x8xf32>
    %cst_16 = arith.constant dense<0xFF800000> : vector<1x8xf32>
    %50 = vector.multi_reduction <maximumf>, %49, %cst_16 [2] : vector<1x8x8xf32> to vector<1x8xf32>
    %51 = vector.shape_cast %50 : vector<1x8xf32> to vector<1x8x1xf32>
    %52 = vector.broadcast %51 : vector<1x8x1xf32> to vector<1x8x8xf32>
    %53 = arith.subf %49, %52 : vector<1x8x8xf32>
    %54 = math.exp %53 : vector<1x8x8xf32>
    %cst_17 = arith.constant dense<0.000000e+00> : vector<1x8xf32>
    %55 = vector.multi_reduction <add>, %54, %cst_17 [2] : vector<1x8x8xf32> to vector<1x8xf32>
    %56 = vector.shape_cast %55 : vector<1x8xf32> to vector<1x8x1xf32>
    %57 = tpu.reciprocal %56 {approx = true} : vector<1x8x1xf32> -> vector<1x8x1xf32>
    %58 = vector.broadcast %57 : vector<1x8x1xf32> to vector<1x8x8xf32>
    %59 = arith.mulf %54, %58 : vector<1x8x8xf32>
    %60 = arith.truncf %59 : vector<1x8x8xf32> to vector<1x8x8xbf16>
    "tpu.trace_start"() <{level = 10 : i32, message = "bqk,bkd->bqd"}> : () -> ()
    %cst_18 = arith.constant dense<0.000000e+00> : vector<1x8x8xf32>
    %61 = tpu.matmul %60, %44, %cst_18 {dimension_numbers = #tpu.dot_dimension_numbers<[2], [1], [1], [2], [0, 0, 0, 1, 1, 2], [0], [0]>} : vector<1x8x8xbf16>, vector<1x8x8xbf16>, vector<1x8x8xf32> -> vector<1x8x8xf32>
    "tpu.trace_stop"() : () -> ()
    %62 = arith.truncf %61 : vector<1x8x8xf32> to vector<1x8x8xbf16>
    %63 = vector.extract_strided_slice %31 {offsets = [0, 0, 8], sizes = [1, 8, 8], strides = [1, 1, 1]} : vector<1x8x32xbf16> to vector<1x8x8xbf16>
    %64 = vector.extract_strided_slice %34 {offsets = [0, 0, 8], sizes = [1, 8, 8], strides = [1, 1, 1]} : vector<1x8x32xbf16> to vector<1x8x8xbf16>
    %65 = vector.extract_strided_slice %37 {offsets = [0, 0, 8], sizes = [1, 8, 8], strides = [1, 1, 1]} : vector<1x8x32xbf16> to vector<1x8x8xbf16>
    "tpu.trace_start"() <{level = 10 : i32, message = "bqd,bkd->bqk"}> : () -> ()
    %cst_19 = arith.constant dense<0.000000e+00> : vector<1x8x8xf32>
    %66 = tpu.matmul %63, %64, %cst_19 {dimension_numbers = #tpu.dot_dimension_numbers<[2], [2], [1], [1], [0, 0, 0, 1, 1, 1], [0], [0]>} : vector<1x8x8xbf16>, vector<1x8x8xbf16>, vector<1x8x8xf32> -> vector<1x8x8xf32>
    "tpu.trace_stop"() : () -> ()
    %cst_20 = arith.constant 0.176776692 : f32
    %67 = vector.broadcast %cst_20 : f32 to vector<1x8x8xf32>
    %68 = arith.mulf %66, %67 : vector<1x8x8xf32>
    %cst_21 = arith.constant -1.000000e+30 : f32
    %69 = vector.broadcast %cst_21 : f32 to vector<1x8x8xf32>
    %70 = arith.select %41, %68, %69 : vector<1x8x8xi1>, vector<1x8x8xf32>
    %cst_22 = arith.constant dense<0xFF800000> : vector<1x8xf32>
    %71 = vector.multi_reduction <maximumf>, %70, %cst_22 [2] : vector<1x8x8xf32> to vector<1x8xf32>
    %72 = vector.shape_cast %71 : vector<1x8xf32> to vector<1x8x1xf32>
    %73 = vector.broadcast %72 : vector<1x8x1xf32> to vector<1x8x8xf32>
    %74 = arith.subf %70, %73 : vector<1x8x8xf32>
    %75 = math.exp %74 : vector<1x8x8xf32>
    %cst_23 = arith.constant dense<0.000000e+00> : vector<1x8xf32>
    %76 = vector.multi_reduction <add>, %75, %cst_23 [2] : vector<1x8x8xf32> to vector<1x8xf32>
    %77 = vector.shape_cast %76 : vector<1x8xf32> to vector<1x8x1xf32>
    %78 = tpu.reciprocal %77 {approx = true} : vector<1x8x1xf32> -> vector<1x8x1xf32>
    %79 = vector.broadcast %78 : vector<1x8x1xf32> to vector<1x8x8xf32>
    %80 = arith.mulf %75, %79 : vector<1x8x8xf32>
    %81 = arith.truncf %80 : vector<1x8x8xf32> to vector<1x8x8xbf16>
    "tpu.trace_start"() <{level = 10 : i32, message = "bqk,bkd->bqd"}> : () -> ()
    %cst_24 = arith.constant dense<0.000000e+00> : vector<1x8x8xf32>
    %82 = tpu.matmul %81, %65, %cst_24 {dimension_numbers = #tpu.dot_dimension_numbers<[2], [1], [1], [2], [0, 0, 0, 1, 1, 2], [0], [0]>} : vector<1x8x8xbf16>, vector<1x8x8xbf16>, vector<1x8x8xf32> -> vector<1x8x8xf32>
    "tpu.trace_stop"() : () -> ()
    %83 = arith.truncf %82 : vector<1x8x8xf32> to vector<1x8x8xbf16>
    %84 = vector.extract_strided_slice %31 {offsets = [0, 0, 16], sizes = [1, 8, 8], strides = [1, 1, 1]} : vector<1x8x32xbf16> to vector<1x8x8xbf16>
    %85 = vector.extract_strided_slice %34 {offsets = [0, 0, 16], sizes = [1, 8, 8], strides = [1, 1, 1]} : vector<1x8x32xbf16> to vector<1x8x8xbf16>
    %86 = vector.extract_strided_slice %37 {offsets = [0, 0, 16], sizes = [1, 8, 8], strides = [1, 1, 1]} : vector<1x8x32xbf16> to vector<1x8x8xbf16>
    "tpu.trace_start"() <{level = 10 : i32, message = "bqd,bkd->bqk"}> : () -> ()
    %cst_25 = arith.constant dense<0.000000e+00> : vector<1x8x8xf32>
    %87 = tpu.matmul %84, %85, %cst_25 {dimension_numbers = #tpu.dot_dimension_numbers<[2], [2], [1], [1], [0, 0, 0, 1, 1, 1], [0], [0]>} : vector<1x8x8xbf16>, vector<1x8x8xbf16>, vector<1x8x8xf32> -> vector<1x8x8xf32>
    "tpu.trace_stop"() : () -> ()
    %cst_26 = arith.constant 0.176776692 : f32
    %88 = vector.broadcast %cst_26 : f32 to vector<1x8x8xf32>
    %89 = arith.mulf %87, %88 : vector<1x8x8xf32>
    %cst_27 = arith.constant -1.000000e+30 : f32
    %90 = vector.broadcast %cst_27 : f32 to vector<1x8x8xf32>
    %91 = arith.select %41, %89, %90 : vector<1x8x8xi1>, vector<1x8x8xf32>
    %cst_28 = arith.constant dense<0xFF800000> : vector<1x8xf32>
    %92 = vector.multi_reduction <maximumf>, %91, %cst_28 [2] : vector<1x8x8xf32> to vector<1x8xf32>
    %93 = vector.shape_cast %92 : vector<1x8xf32> to vector<1x8x1xf32>
    %94 = vector.broadcast %93 : vector<1x8x1xf32> to vector<1x8x8xf32>
    %95 = arith.subf %91, %94 : vector<1x8x8xf32>
    %96 = math.exp %95 : vector<1x8x8xf32>
    %cst_29 = arith.constant dense<0.000000e+00> : vector<1x8xf32>
    %97 = vector.multi_reduction <add>, %96, %cst_29 [2] : vector<1x8x8xf32> to vector<1x8xf32>
    %98 = vector.shape_cast %97 : vector<1x8xf32> to vector<1x8x1xf32>
    %99 = tpu.reciprocal %98 {approx = true} : vector<1x8x1xf32> -> vector<1x8x1xf32>
    %100 = vector.broadcast %99 : vector<1x8x1xf32> to vector<1x8x8xf32>
    %101 = arith.mulf %96, %100 : vector<1x8x8xf32>
    %102 = arith.truncf %101 : vector<1x8x8xf32> to vector<1x8x8xbf16>
    "tpu.trace_start"() <{level = 10 : i32, message = "bqk,bkd->bqd"}> : () -> ()
    %cst_30 = arith.constant dense<0.000000e+00> : vector<1x8x8xf32>
    %103 = tpu.matmul %102, %86, %cst_30 {dimension_numbers = #tpu.dot_dimension_numbers<[2], [1], [1], [2], [0, 0, 0, 1, 1, 2], [0], [0]>} : vector<1x8x8xbf16>, vector<1x8x8xbf16>, vector<1x8x8xf32> -> vector<1x8x8xf32>
    "tpu.trace_stop"() : () -> ()
    %104 = arith.truncf %103 : vector<1x8x8xf32> to vector<1x8x8xbf16>
    %105 = vector.extract_strided_slice %31 {offsets = [0, 0, 24], sizes = [1, 8, 8], strides = [1, 1, 1]} : vector<1x8x32xbf16> to vector<1x8x8xbf16>
    %106 = vector.extract_strided_slice %34 {offsets = [0, 0, 24], sizes = [1, 8, 8], strides = [1, 1, 1]} : vector<1x8x32xbf16> to vector<1x8x8xbf16>
    %107 = vector.extract_strided_slice %37 {offsets = [0, 0, 24], sizes = [1, 8, 8], strides = [1, 1, 1]} : vector<1x8x32xbf16> to vector<1x8x8xbf16>
    "tpu.trace_start"() <{level = 10 : i32, message = "bqd,bkd->bqk"}> : () -> ()
    %cst_31 = arith.constant dense<0.000000e+00> : vector<1x8x8xf32>
    %108 = tpu.matmul %105, %106, %cst_31 {dimension_numbers = #tpu.dot_dimension_numbers<[2], [2], [1], [1], [0, 0, 0, 1, 1, 1], [0], [0]>} : vector<1x8x8xbf16>, vector<1x8x8xbf16>, vector<1x8x8xf32> -> vector<1x8x8xf32>
    "tpu.trace_stop"() : () -> ()
    %cst_32 = arith.constant 0.176776692 : f32
    %109 = vector.broadcast %cst_32 : f32 to vector<1x8x8xf32>
    %110 = arith.mulf %108, %109 : vector<1x8x8xf32>
    %cst_33 = arith.constant -1.000000e+30 : f32
    %111 = vector.broadcast %cst_33 : f32 to vector<1x8x8xf32>
    %112 = arith.select %41, %110, %111 : vector<1x8x8xi1>, vector<1x8x8xf32>
    %cst_34 = arith.constant dense<0xFF800000> : vector<1x8xf32>
    %113 = vector.multi_reduction <maximumf>, %112, %cst_34 [2] : vector<1x8x8xf32> to vector<1x8xf32>
    %114 = vector.shape_cast %113 : vector<1x8xf32> to vector<1x8x1xf32>
    %115 = vector.broadcast %114 : vector<1x8x1xf32> to vector<1x8x8xf32>
    %116 = arith.subf %112, %115 : vector<1x8x8xf32>
    %117 = math.exp %116 : vector<1x8x8xf32>
    %cst_35 = arith.constant dense<0.000000e+00> : vector<1x8xf32>
    %118 = vector.multi_reduction <add>, %117, %cst_35 [2] : vector<1x8x8xf32> to vector<1x8xf32>
    %119 = vector.shape_cast %118 : vector<1x8xf32> to vector<1x8x1xf32>
    %120 = tpu.reciprocal %119 {approx = true} : vector<1x8x1xf32> -> vector<1x8x1xf32>
    %121 = vector.broadcast %120 : vector<1x8x1xf32> to vector<1x8x8xf32>
    %122 = arith.mulf %117, %121 : vector<1x8x8xf32>
    %123 = arith.truncf %122 : vector<1x8x8xf32> to vector<1x8x8xbf16>
    "tpu.trace_start"() <{level = 10 : i32, message = "bqk,bkd->bqd"}> : () -> ()
    %cst_36 = arith.constant dense<0.000000e+00> : vector<1x8x8xf32>
    %124 = tpu.matmul %123, %107, %cst_36 {dimension_numbers = #tpu.dot_dimension_numbers<[2], [1], [1], [2], [0, 0, 0, 1, 1, 2], [0], [0]>} : vector<1x8x8xbf16>, vector<1x8x8xbf16>, vector<1x8x8xf32> -> vector<1x8x8xf32>
    "tpu.trace_stop"() : () -> ()
    %125 = arith.truncf %124 : vector<1x8x8xf32> to vector<1x8x8xbf16>
    %126 = tpu.concatenate %62, %83, %104, %125 in 2 : vector<1x8x8xbf16>, vector<1x8x8xbf16>, vector<1x8x8xbf16>, vector<1x8x8xbf16> -> vector<1x8x32xbf16>
    %127 = vector.shape_cast %126 : vector<1x8x32xbf16> to vector<8x32xbf16>
    %c0_37 = arith.constant 0 : index
    %c0_38 = arith.constant 0 : index
    %128 = vector.load %arg5[%c0_37, %c0_38] : memref<32x32xbf16, #tpu.memory_space<vmem>>, vector<32x32xbf16>
    %cst_39 = arith.constant dense<0.000000e+00> : vector<8x32xf32>
    %129 = tpu.matmul %127, %128, %cst_39 {dimension_numbers = #tpu.dot_dimension_numbers<[1], [0], [0], [1], [0, 0, 1, 1], [], []>} : vector<8x32xbf16>, vector<32x32xbf16>, vector<8x32xf32> -> vector<8x32xf32>
    %130 = arith.addf %1, %129 : vector<8x32xf32>
    %c0_40 = arith.constant 0 : index
    %c0_41 = arith.constant 0 : index
    %131 = vector.load %arg6[%c0_40, %c0_41] : memref<1x32xf32, #tpu.memory_space<vmem>>, vector<1x32xf32>
    %132 = vector.broadcast %131 : vector<1x32xf32> to vector<8x32xf32>
    %133 = arith.addf %130, %132 : vector<8x32xf32>
    %cst_42 = arith.constant dense<0.000000e+00> : vector<8xf32>
    %134 = vector.multi_reduction <add>, %133, %cst_42 [1] : vector<8x32xf32> to vector<8xf32>
    %135 = vector.shape_cast %134 : vector<8xf32> to vector<8x1xf32>
    %cst_43 = arith.constant 3.200000e+01 : f32
    %136 = vector.broadcast %cst_43 : f32 to vector<8x1xf32>
    %137 = arith.divf %135, %136 : vector<8x1xf32>
    %138 = vector.broadcast %137 : vector<8x1xf32> to vector<8x32xf32>
    %139 = arith.subf %133, %138 : vector<8x32xf32>
    %140 = arith.mulf %139, %139 : vector<8x32xf32>
    %cst_44 = arith.constant dense<0.000000e+00> : vector<8xf32>
    %141 = vector.multi_reduction <add>, %140, %cst_44 [1] : vector<8x32xf32> to vector<8xf32>
    %142 = vector.shape_cast %141 : vector<8xf32> to vector<8x1xf32>
    %cst_45 = arith.constant 3.200000e+01 : f32
    %143 = vector.broadcast %cst_45 : f32 to vector<8x1xf32>
    %144 = arith.divf %142, %143 : vector<8x1xf32>
    %145 = vector.broadcast %137 : vector<8x1xf32> to vector<8x32xf32>
    %146 = arith.subf %133, %145 : vector<8x32xf32>
    %cst_46 = arith.constant 9.99999974E-6 : f32
    %147 = vector.broadcast %cst_46 : f32 to vector<8x1xf32>
    %148 = arith.addf %144, %147 : vector<8x1xf32>
    %149 = math.rsqrt %148 : vector<8x1xf32>
    %150 = vector.broadcast %149 : vector<8x1xf32> to vector<8x32xf32>
    %151 = arith.mulf %146, %150 : vector<8x32xf32>
    %c0_47 = arith.constant 0 : index
    %c0_48 = arith.constant 0 : index
    %152 = vector.load %arg7[%c0_47, %c0_48] : memref<1x32xf32, #tpu.memory_space<vmem>>, vector<1x32xf32>
    %153 = vector.broadcast %152 : vector<1x32xf32> to vector<8x32xf32>
    %154 = arith.mulf %151, %153 : vector<8x32xf32>
    %c0_49 = arith.constant 0 : index
    %c0_50 = arith.constant 0 : index
    %155 = vector.load %arg8[%c0_49, %c0_50] : memref<1x32xf32, #tpu.memory_space<vmem>>, vector<1x32xf32>
    %156 = vector.broadcast %155 : vector<1x32xf32> to vector<8x32xf32>
    %157 = arith.addf %154, %156 : vector<8x32xf32>
    %158 = arith.truncf %157 : vector<8x32xf32> to vector<8x32xbf16>
    %c0_51 = arith.constant 0 : index
    %c0_52 = arith.constant 0 : index
    %159 = vector.load %arg9[%c0_51, %c0_52] : memref<32x128xbf16, #tpu.memory_space<vmem>>, vector<32x128xbf16>
    %cst_53 = arith.constant dense<0.000000e+00> : vector<8x128xf32>
    %160 = tpu.matmul %158, %159, %cst_53 {dimension_numbers = #tpu.dot_dimension_numbers<[1], [0], [0], [1], [0, 0, 1, 1], [], []>} : vector<8x32xbf16>, vector<32x128xbf16>, vector<8x128xf32> -> vector<8x128xf32>
    %c0_54 = arith.constant 0 : index
    %c0_55 = arith.constant 0 : index
    %161 = vector.load %arg10[%c0_54, %c0_55] : memref<1x128xf32, #tpu.memory_space<vmem>>, vector<1x128xf32>
    %162 = vector.broadcast %161 : vector<1x128xf32> to vector<8x128xf32>
    %163 = arith.addf %160, %162 : vector<8x128xf32>
    %cst_56 = arith.constant 0.000000e+00 : f32
    %164 = vector.broadcast %cst_56 : f32 to vector<8x128xf32>
    %165 = arith.maximumf %163, %164 : vector<8x128xf32>
    %166 = arith.truncf %165 : vector<8x128xf32> to vector<8x128xbf16>
    %c0_57 = arith.constant 0 : index
    %c0_58 = arith.constant 0 : index
    %167 = vector.load %arg11[%c0_57, %c0_58] : memref<128x32xbf16, #tpu.memory_space<vmem>>, vector<128x32xbf16>
    %cst_59 = arith.constant dense<0.000000e+00> : vector<8x32xf32>
    %168 = tpu.matmul %166, %167, %cst_59 {dimension_numbers = #tpu.dot_dimension_numbers<[1], [0], [0], [1], [0, 0, 1, 1], [], []>} : vector<8x128xbf16>, vector<128x32xbf16>, vector<8x32xf32> -> vector<8x32xf32>
    %c0_60 = arith.constant 0 : index
    %c0_61 = arith.constant 0 : index
    %169 = vector.load %arg12[%c0_60, %c0_61] : memref<1x32xf32, #tpu.memory_space<vmem>>, vector<1x32xf32>
    %170 = vector.broadcast %169 : vector<1x32xf32> to vector<8x32xf32>
    %171 = arith.addf %168, %170 : vector<8x32xf32>
    %172 = arith.addf %133, %171 : vector<8x32xf32>
    %173 = vector.shape_cast %172 : vector<8x32xf32> to vector<1x8x32xf32>
    %c0_62 = arith.constant 0 : index
    %c0_63 = arith.constant 0 : index
    %c0_64 = arith.constant 0 : index
    %174 = vector.load %arg13[%c0_62, %c0_63, %c0_64] : memref<1x8x32xf32, #tpu.memory_space<vmem>>, vector<1x8x32xf32>
    tpu.vector_store %arg13[%c0_62, %c0_63, %c0_64], %173 {strides = array<i32>} : memref<1x8x32xf32, #tpu.memory_space<vmem>>, vector<1x8x32xf32>,
    return
  }
  func.func @transform_0(%arg0: i32) -> (i32, i32, i32) {
    %c0_i32 = arith.constant 0 : i32
    %c0_i32_0 = arith.constant 0 : i32
    %c0_i32_1 = arith.constant 0 : i32
    return %arg0, %c0_i32, %c0_i32_0 : i32, i32, i32
  }
  func.func @transform_1(%arg0: i32) -> (i32, i32) {
    %c0_i32 = arith.constant 0 : i32
    %c0_i32_0 = arith.constant 0 : i32
    %c0_i32_1 = arith.constant 0 : i32
    return %c0_i32, %c0_i32_0 : i32, i32
  }
  func.func @transform_2(%arg0: i32) -> (i32, i32) {
    %c0_i32 = arith.constant 0 : i32
    %c0_i32_0 = arith.constant 0 : i32
    %c0_i32_1 = arith.constant 0 : i32
    return %c0_i32, %c0_i32_0 : i32, i32
  }
  func.func @transform_3(%arg0: i32) -> (i32, i32) {
    %c0_i32 = arith.constant 0 : i32
    %c0_i32_0 = arith.constant 0 : i32
    %c0_i32_1 = arith.constant 0 : i32
    return %c0_i32, %c0_i32_0 : i32, i32
  }
  func.func @transform_4(%arg0: i32) -> (i32, i32) {
    %c0_i32 = arith.constant 0 : i32
    %c0_i32_0 = arith.constant 0 : i32
    %c0_i32_1 = arith.constant 0 : i32
    return %c0_i32, %c0_i32_0 : i32, i32
  }
  func.func @transform_5(%arg0: i32) -> (i32, i32) {
    %c0_i32 = arith.constant 0 : i32
    %c0_i32_0 = arith.constant 0 : i32
    %c0_i32_1 = arith.constant 0 : i32
    return %c0_i32, %c0_i32_0 : i32, i32
  }
  func.func @transform_6(%arg0: i32) -> (i32, i32) {
    %c0_i32 = arith.constant 0 : i32
    %c0_i32_0 = arith.constant 0 : i32
    %c0_i32_1 = arith.constant 0 : i32
    return %c0_i32, %c0_i32_0 : i32, i32
  }
  func.func @transform_7(%arg0: i32) -> (i32, i32) {
    %c0_i32 = arith.constant 0 : i32
    %c0_i32_0 = arith.constant 0 : i32
    %c0_i32_1 = arith.constant 0 : i32
    return %c0_i32, %c0_i32_0 : i32, i32
  }
  func.func @transform_8(%arg0: i32) -> (i32, i32) {
    %c0_i32 = arith.constant 0 : i32
    %c0_i32_0 = arith.constant 0 : i32
    %c0_i32_1 = arith.constant 0 : i32
    return %c0_i32, %c0_i32_0 : i32, i32
  }
  func.func @transform_9(%arg0: i32) -> (i32, i32) {
    %c0_i32 = arith.constant 0 : i32
    %c0_i32_0 = arith.constant 0 : i32
    %c0_i32_1 = arith.constant 0 : i32
    return %c0_i32, %c0_i32_0 : i32, i32
  }
  func.func @transform_10(%arg0: i32) -> (i32, i32) {
    %c0_i32 = arith.constant 0 : i32
    %c0_i32_0 = arith.constant 0 : i32
    %c0_i32_1 = arith.constant 0 : i32
    return %c0_i32, %c0_i32_0 : i32, i32
  }
  func.func @transform_11(%arg0: i32) -> (i32, i32) {
    %c0_i32 = arith.constant 0 : i32
    %c0_i32_0 = arith.constant 0 : i32
    %c0_i32_1 = arith.constant 0 : i32
    return %c0_i32, %c0_i32_0 : i32, i32
  }
  func.func @transform_12(%arg0: i32) -> (i32, i32, i32) {
    %c0_i32 = arith.constant 0 : i32
    %c0_i32_0 = arith.constant 0 : i32
    %c0_i32_1 = arith.constant 0 : i32
    return %arg0, %c0_i32, %c0_i32_0 : i32, i32, i32
  }
}

</mosaic_0001>

<bundles_post_ra>
// kernel: tpu_custom_call.1
= control target key start
LH: loop header
LB: loop body
LE: loop exit
PB: predicated region body
PF: predicated region fallthrough
CT: control target
= control target key end

     0   :  { %s2003_s0 = inlined_call_operand.vmem [shape: f32[2,8,32], index: 0, kind: input, shape index: {}]   ;;  %s2004_s1 = inlined_call_operand.vmem [shape: f32[1,32], index: 1, kind: input, shape index: {}]   ;;  %s2005_s2 = inlined_call_operand.vmem [shape: f32[1,32], index: 2, kind: input, shape index: {}]   ;;  %s2006_s3 = inlined_call_operand.vmem [shape: bf16[32,96], index: 3, kind: input, shape index: {}]   ;;  %s2007_s4 = inlined_call_operand.vmem [shape: bf16[32,32], index: 4, kind: input, shape index: {}]   ;;  %s2008_s5 = inlined_call_operand.vmem [shape: f32[1,32], index: 5, kind: input, shape index: {}]   ;;  %s2009_s6 = inlined_call_operand.vmem [shape: f32[1,32], index: 6, kind: input, shape index: {}]   ;;  %s2010_s7 = inlined_call_operand.vmem [shape: f32[1,32], index: 7, kind: input, shape index: {}]   ;;  %s2011_s8 = inlined_call_operand.vmem [shape: bf16[32,128], index: 8, kind: input, shape index: {}]   ;;  %s2012_s9 = inlined_call_operand.vmem [shape: f32[1,128], index: 9, kind: input, shape index: {}]   ;;  %s2013_s10 = inlined_call_operand.vmem [shape: bf16[128,32], index: 10, kind: input, shape index: {}]   ;;  %s2014_s11 = inlined_call_operand.vmem [shape: f32[1,32], index: 11, kind: input, shape index: {}]   ;;  %s2015_s12 = inlined_call_operand.hbm [shape: f32[2,8,32], index: 12, kind: output, shape index: {}]  }
   0x1   :  { %2016 = sst [smem:[#allocation5_spill]] %s2003_s0 }
   0x2   :  { %2017 = sst [smem:[#allocation6_spill]] %s2004_s1 }
   0x3   :  { %17 = vsyncpa [#allocation3], 0 }
   0x4   :  { %19 = vsyncpa [#allocation3 + $0x1], 0  ;;  %s1733_s21 = smov 0   ;;  %s1735_s22 = smov 0  }
   0x5   :  { %s1737_s23 = smov 0   ;;  %s1739_s24 = smov 0  }
   0x6 LB: > { %s1754_s25 = sadd.s32 4294967295, %s1649_s24   ;;  %s1330_s26 = sadd.s32 4294967294, %s1649_s24   ;;  %s1649_s24 = sphi %s1739_s24, %s2025_s24   ;;  %s1645_s23 = sphi %s1737_s23, %s2024_s23   ;;  %s1641_s22 = sphi %s1735_s22, %s2023_s22   ;;  %s1637_s21 = sphi %s1733_s21, %s2022_s21  }
   0x7   : > { %s1758_s27 = sadd.s32 1, %s1649_s24   ;;  %s289_s28 = sadd.s32 1, %s1645_s23 }
   0x8   : > { %s286_s29 = ssub.s32 %s1649_s24, %s1758_s27  ;;  %p299_p0 = scmp.ne.s32.totalorder %s1645_s23, %s1641_s22 }
   0x9   : > { %p287_p1 = scmp.eq.s32.totalorder %s286_s29, 0  ;;  %p300_p2 = scmp.eq.s32.totalorder %s1754_s25, 1 }
   0xa   : > { %p305_p3 = scmp.ne.s32.totalorder %s1641_s22, %s1637_s21  ;;  %p306_p4 = scmp.eq.s32.totalorder %s1330_s26, 1 }
   0xb   : > { %s1769_s30 = scalar_select %p287_p1, %s1645_s23, %s289_s28  }
   0xc   : > { %p1771_p5 = por %p300_p2, %p299_p0  ;;  %p1775_p6 = por %p306_p4, %p305_p3 }
   0xd   : > { %p1333_p7 = scmp.ge.s32.totalorder %s1649_s24, 1  ;;  %p364_p8 = scmp.lt.s32.totalorder %s1649_s24, 3 }
   0xf   : > { %p365_p9 = pnand %p1333_p7, %p364_p8 }
  0x10   : > { %p405_p10 = scmp.lt.s32.totalorder (!%p365_p9), %s1754_s25, 1  ;;  %vm411_vm0 = vcmask (!%p365_p9), 261120   ;;  %s2020_s0 = sld [smem:[#allocation5_spill]] (!%p365_p9)  ;;  %v1553_v7 = vld [vmem:[%s2006_s3] sm:$0xff] (!%p365_p9)   ;;  %v1651_v8 = vmov (!%p365_p9), 0.0   ;;  %vm1652_vm1 = vmmov (!%p365_p9), 0   ;;  %v503_v36 = vlaneseq (!%p365_p9) }
  0x11   : > { %368 = sbr.rel (%p365_p9) target bundleno = 2582 (0xa16), region = 68  ;;  %1406 = vmatprep.subr.bf16.mxu0 (!%p365_p9), %v1651_v8  ;;  %1410 = vmatprep.mubr.msk.bf16.mxu0 (!%p365_p9), %vm1652_vm1, %v1651_v8  ;;  %v1554_v9 = vld [vmem:[%s2006_s3 + $0x8] sm:$0xff] (!%p365_p9)   ;;  %s2021_s1 = sld [smem:[#allocation6_spill]] (!%p365_p9)  ;;  %v1337_v16 = vld [vmem:[%s2005_s2] ss:$0 sm:$0xff] (!%p365_p9)  ;;  %vm511_vm2 = vcmask (!%p365_p9), 64512  }
  0x12   : > { %1407 = vmatpush3.bf16.msra.mxu0 (!%p365_p9), %v1553_v7  ;;  %1426 = vmatprep.subr.bf16.mxu1 (!%p365_p9), %v1651_v8  ;;  %s1654_s20 = smov (!%p365_p9), 96   ;;  %s1655_s26 = smov (!%p365_p9), 88   ;;  %v504_v37 = vshrl.u32 (!%p365_p9), %v503_v36, 7  ;;  %v506_v38 = vand.u32 (!%p365_p9), 127, %v503_v36  ;;  %vm577_vm4 = vcmask (!%p365_p9), 1043456   ;;  %vm973_vm5 = vcmask (!%p365_p9), 130048  }
  0x13   : > { %1408 = vmatprep.subr.bf16.mxu0 (!%p365_p9), %v1651_v8  ;;  %1428 = vmatprep.mubr.msk.bf16.mxu1 (!%p365_p9), %vm1652_vm1, %v1651_v8  ;;  %s1656_s28 = smov (!%p365_p9), 80   ;;  %s1657_s29 = smov (!%p365_p9), 112   ;;  %vm976_vm6 = vcmask (!%p365_p9), 195584  }
  0x14   : > { %vm507_vm3 = vcmp.le.s32.totalorder (!%p365_p9), %v506_v38, %v504_v37  ;;  %s1660_s17 = smov (!%p365_p9), 64   ;;  %s1661_s18 = smov (!%p365_p9), 56  }
  0x16   : > { %1409 = vmatpush3.bf16.msra.mxu0 (!%p365_p9), %v1554_v9 }
  0x17   : > { %1414 = vmatprep.subr.bf16.mxu0 (!%p365_p9), %v1651_v8  ;;  %v1336_v14 = vld [vmem:[%s2021_s1] ss:$0 sm:$0xff] (!%p365_p9) }
  0x18   : > { %s406_s15 = scalar_select %p405_p10, %s1754_s25, 1 }
  0x1a   : > { %s1335_s16 = sshll.u32 %s406_s15, 3  ;;  %s1658_s15 = smov 72  }
  0x1b   : > { %s408_s19 = scalar_lea.vmem %s2020_s0, %s1335_s16  ;;  %s1659_s16 = smov 104  }
  0x1c   : > { %v1786_v0 = vld [vmem:[%s408_s19] sm:$0xff]  ;;  %s1653_s19 = smov 120  }
  0x1d   : > { %v412_v1 = vsel %vm411_vm0, %v1786_v0, 0.0 }
  0x1e   : > { %413 = vadd.xlane.f32.xlu0 %v412_v1 }
  0xab   : > { %v414_v2 = vpop.xlane.xlu0 %413 }
  0xac   : > { %v416_v3 = vmul.f32 0.03125, %v414_v2 }
  0xae   : > { %v417_v4 = vsub.f32 %v1786_v0, %v416_v3 }
  0xb0   : > { %v418_v5 = vmul.f32 %v417_v4, %v417_v4 }
  0xb2   : > { %v419_v6 = vsel %vm411_vm0, %v418_v5, 0.0 }
  0xb3   : > { %420 = vadd.xlane.f32.xlu0 %v419_v6 }
 0x140   : > { %v421_v10 = vpop.xlane.xlu0 %420 }
 0x141   : > { %v422_v11 = vmul.f32 0.03125, %v421_v10 }
 0x143   : > { %v423_v12 = vadd.f32 1e-05, %v422_v11 }
 0x145   : > { %1567 = vrsqrt.f32 %v423_v12 }
 0x14f   : > { %v1568_v13 = vpop.eup %1567 }
 0x150   : > { %v425_v15 = vmul.f32 %v1568_v13, %v417_v4 }
 0x152   : > { %v433_v17 = vmul.f32 %v1336_v14, %v425_v15 }
 0x154   : > { %v441_v18 = vadd.f32 %v1337_v16, %v433_v17 }
 0x156   : > { %v442_v19 = vpack.c.bf16 %v441_v18, %v441_v18 }
 0x158   : > { %1411 = vmatmul.mubr.msk.bf16.vlgmr.msra.gmra.mrb[0].mxu0 %vm411_vm0, %v442_v19 }
 0x159   : > { %1416 = vmatprep.mubr.msk.bf16.mxu0 %vm1652_vm1, %v1651_v8 }
 0x22b   : > { %v496_v20 = vpop.f32.mrb[0].mxu0 }
 0x22c   : > { %v1815_v21 = vpack.c.bf16 %v496_v20, %v496_v20  ;;  %v1412_v22 = vpop.f32.mrb[1].mxu0 }
 0x22d   : > { %v499_v23 = vpop.f32.mrb[2].mxu0 }
 0x22e   : > { %622 = vrot.lane.b32.xlu0 %v1815_v21, %s1653_s19  ;;  %509 = vrot.lane.b32.xlu1 %v1815_v21, %s1654_s20  ;;  %v1413_v24 = vpop.f32.mrb[3].mxu0  ;;  %s1662_s19 = smov 48   ;;  %s1663_s20 = smov 40  }
 0x232   : > { %624 = vrot.lane.b32.xlu1 %v1815_v21, %s1655_s26  ;;  %s1664_s26 = smov 8  }
 0x236   : > { %737 = vrot.lane.b32.xlu1 %v1815_v21, %s1656_s28  ;;  %s1667_s28 = smov [#allocation2]  }
 0x23a   : > { %735 = vrot.lane.b32.xlu1 %v1815_v21, %s1657_s29  ;;  %s1591_s29 = sshll.u32 %s1667_s28, 4  ;;  %s1592_s29 = int_to_ptr.vmem [resolvable:$false] %s1591_s29 }
 0x23b   : > { %s1593_s1 = scalar_lea.vmem %s1592_s29, 256 }
 0x23e   : > { %850 = vrot.lane.b32.xlu1 %v1815_v21, %s1658_s15  ;;  %s1369_s15 = sshll.u32 %s1754_s25, 7 }
 0x23f   : > { %s1960_s0 = scalar_lea.hbm %s2015_s12, %s1369_s15 }
 0x242   : > { %848 = vrot.lane.b32.xlu1 %v1815_v21, %s1659_s16 }
 0x2a0   : > { %v510_v25 = vpop.permute.xlu1 %509  ;;  %v623_v30 = vpop.permute.xlu0 %622 }
 0x2a1   : > { %v516_v26 = vsel %vm511_vm2, %v510_v25, 0 }
 0x2a2   : > { %1415 = vmatpush3.bf16.xpose.msra.mxu0 %v516_v26 }
 0x2a3   : > { %1420 = vmatprep.subr.bf16.mxu0 %v1651_v8 }
 0x2a4   : > { %v625_v27 = vpop.permute.xlu1 %624 }
 0x2a5   : > { %v630_v28 = vsel %vm511_vm2, %v625_v27, 0 }
 0x2a6   : > { %1427 = vmatpush3.bf16.xpose.msra.mxu1 %v630_v28 }
 0x2a7   : > { %1438 = vmatprep.subr.bf16.mxu1 %v1651_v8 }
 0x2a8   : > { %v738_v29 = vpop.permute.xlu1 %737 }
 0x2a9   : > { %1417 = vmatmul.mubr.msk.bf16.vlgmr.msra.gmra.mrb[4].mxu0 %vm511_vm2, %v1815_v21  ;;  %v743_v32 = vsel %vm511_vm2, %v738_v29, 0 }
 0x2aa   : > { %1422 = vmatprep.mubr.msk.bf16.mxu0 %vm1652_vm1, %v1651_v8 }
 0x2ac   : > { %v736_v31 = vpop.permute.xlu1 %735 }
 0x2ad   : > { %1429 = vmatmul.mubr.msk.bf16.vlgmr.msra.gmra.mrb[0].mxu1 %vm511_vm2, %v623_v30 }
 0x2ae   : > { %1439 = vmatpush3.bf16.xpose.msra.mxu1 %v743_v32  ;;  %1440 = vmatprep.mubr.msk.bf16.mxu1 %vm1652_vm1, %v1651_v8 }
 0x2af   : > { %1450 = vmatprep.subr.bf16.mxu1 %v1651_v8 }
 0x2b0   : > { %v851_v33 = vpop.permute.xlu1 %850 }
 0x2b1   : > { %v856_v34 = vsel %vm511_vm2, %v851_v33, 0 }
 0x2b4   : > { %v849_v35 = vpop.permute.xlu1 %848 }
 0x2b5   : > { %1441 = vmatmul.mubr.msk.bf16.vlgmr.msra.gmra.mrb[4].mxu1 %vm511_vm2, %v736_v31 }
 0x2b6   : > { %1451 = vmatpush3.bf16.xpose.msra.mxu1 %v856_v34  ;;  %1452 = vmatprep.mubr.msk.bf16.mxu1 %vm1652_vm1, %v1651_v8 }
 0x2b7   : > { %1462 = vmatprep.subr.bf16.mxu1 %v1651_v8 }
 0x2bd   : > { %1453 = vmatmul.mubr.msk.bf16.vlgmr.msra.gmra.mrb[8].mxu1 %vm511_vm2, %v849_v35 }
 0x2be   : > { %1466 = vmatprep.mubr.msk.bf16.mxu1 %vm1652_vm1, %v1651_v8 }
 0x37c   : > { %v552_v39 = vpop.f32.mrb[4].mxu0 }
 0x37d   : > { %v558_v40 = vmul.f32 0.17677669, %v552_v39  ;;  %v1418_v41 = vpop.f32.mrb[5].mxu0 }
 0x37e   : > { %v555_v42 = vpop.f32.mrb[6].mxu0 }
 0x37f   : > { %v1419_v43 = vpop.f32.mrb[7].mxu0  ;;  %v559_v44 = vsel %vm507_vm3, %v558_v40, -1e+30 }
 0x380   : > { %v666_v45 = vpop.f32.mrb[0].mxu1  ;;  %v560_v46 = vsel %vm511_vm2, %v559_v44, -inf }
 0x381   : > { %v672_v47 = vmul.f32 0.17677669, %v666_v45  ;;  %v1430_v48 = vpop.f32.mrb[1].mxu1  ;;  %561 = vmax.xlane.f32.xlu1 %v560_v46 }
 0x382   : > { %v669_v49 = vpop.f32.mrb[2].mxu1 }
 0x383   : > { %v1431_v50 = vpop.f32.mrb[3].mxu1  ;;  %v673_v51 = vsel %vm507_vm3, %v672_v47, -1e+30 }
 0x384   : > { %v674_v52 = vsel %vm511_vm2, %v673_v51, -inf }
 0x385   : > { %675 = vmax.xlane.f32.xlu0 %v674_v52 }
 0x388   : > { %v779_v53 = vpop.f32.mrb[4].mxu1 }
 0x389   : > { %v785_v54 = vmul.f32 0.17677669, %v779_v53  ;;  %v1442_v55 = vpop.f32.mrb[5].mxu1 }
 0x38a   : > { %v782_v56 = vpop.f32.mrb[6].mxu1 }
 0x38b   : > { %v1443_v57 = vpop.f32.mrb[7].mxu1  ;;  %v786_v58 = vsel %vm507_vm3, %v785_v54, -1e+30 }
 0x38c   : > { %v787_v59 = vsel %vm511_vm2, %v786_v58, -inf }
 0x38d   : > { %788 = vmax.xlane.f32.xlu1 %v787_v59  ;;  %v1556_v59 = vld [vmem:[%s2007_s4 + $0x8] sm:$0xff]  }
 0x390   : > { %v892_v60 = vpop.f32.mrb[8].mxu1 }
 0x391   : > { %v898_v61 = vmul.f32 0.17677669, %v892_v60  ;;  %v1454_v62 = vpop.f32.mrb[9].mxu1 }
 0x392   : > { %v895_v63 = vpop.f32.mrb[10].mxu1 }
 0x393   : > { %v1455_v1 = vpop.f32.mrb[11].mxu1  ;;  %v899_v2 = vsel %vm507_vm3, %v898_v61, -1e+30 }
 0x394   : > { %v900_v3 = vsel %vm511_vm2, %v899_v2, -inf }
 0x395   : > { %901 = vmax.xlane.f32.xlu0 %v900_v3 }
 0x40e   : > { %v562_v4 = vpop.xlane.xlu1 %561 }
 0x40f   : > { %v563_v5 = vsub.f32 %v559_v44, %v562_v4 }
 0x411   : > { %v564_v6 = vmul.f32 1.442695, %v563_v5 }
 0x412   : > { %v676_v7 = vpop.xlane.xlu0 %675 }
 0x413   : > { %1569 = vpow2.f32 %v564_v6  ;;  %v677_v9 = vsub.f32 %v673_v51, %v676_v7 }
 0x415   : > { %v678_v10 = vmul.f32 1.442695, %v677_v9 }
 0x417   : > { %1571 = vpow2.f32 %v678_v10 }
 0x41a   : > { %v789_v20 = vpop.xlane.xlu1 %788 }
 0x41b   : > { %v790_v22 = vsub.f32 %v786_v58, %v789_v20  ;;  %v1555_v58 = vld [vmem:[%s2007_s4] sm:$0xff]  }
 0x41c   : > { %1463 = vmatpush3.bf16.msra.mxu1 %v1555_v58 }
 0x41d   : > { %v1570_v11 = vpop.eup %1569  ;;  %v791_v23 = vmul.f32 1.442695, %v790_v22  ;;  %1464 = vmatprep.subr.bf16.mxu1 %v1651_v8 }
 0x41e   : > { %v566_v12 = vsel %vm511_vm2, %v1570_v11, 0.0 }
 0x41f   : > { %567 = vadd.xlane.f32.xlu1 %v566_v12 }
 0x420   : > { %1465 = vmatpush3.bf16.msra.mxu1 %v1556_v59 }
 0x421   : > { %v1572_v13 = vpop.eup %1571  ;;  %1478 = vmatprep.subr.bf16.mxu1 %v1651_v8 }
 0x422   : > { %v902_v14 = vpop.xlane.xlu0 %901  ;;  %v680_v15 = vsel %vm511_vm2, %v1572_v13, 0.0 }
 0x423   : > { %v903_v16 = vsub.f32 %v899_v2, %v902_v14  ;;  %681 = vadd.xlane.f32.xlu0 %v680_v15 }
 0x425   : > { %v904_v17 = vmul.f32 1.442695, %v903_v16  ;;  %v1352_v16 = vld [vmem:[%s2008_s5] ss:$0 sm:$0xff] }
 0x427   : > { %1573 = vpow2.f32 %v904_v17 }
 0x428   : > { %1575 = vpow2.f32 %v791_v23 }
 0x430   : > { %572 = vrot.lane.b32.xlu1 %v1815_v21, %s1660_s17  ;;  %s1665_s17 = smov 16  }
 0x431   : > { %v1574_v18 = vpop.eup %1573 }
 0x432   : > { %v906_v19 = vsel %vm511_vm2, %v1574_v18, 0.0  ;;  %v1576_v24 = vpop.eup %1575 }
 0x433   : > { %907 = vadd.xlane.f32.xlu0 %v906_v19  ;;  %v793_v25 = vsel %vm511_vm2, %v1576_v24, 0.0 }
 0x449   : > { %686 = vrot.lane.b32.xlu0 %v1815_v21, %s1661_s18  ;;  %s1666_s18 = smov 24  }
 0x454   : > { %794 = vadd.xlane.f32.xlu1 %v793_v25 }
 0x465   : > { %799 = vrot.lane.b32.xlu1 %v1815_v21, %s1662_s19 }
 0x469   : > { %912 = vrot.lane.b32.xlu1 %v1815_v21, %s1663_s20  ;;  %s402_s20 = sand.u32 1, %s1641_s22  }
 0x46a   : > { %s1258_s25 = scalar_lea.sflag [#allocation3], %s402_s20 }
 0x4ac   : > { %v568_v26 = vpop.xlane.xlu1 %567 }
 0x4ad   : > { %1577 = vrcp.f32 %v568_v26 }
 0x4b0   : > { %v573_v27 = vpop.permute.xlu1 %572  ;;  %v682_v29 = vpop.xlane.xlu0 %681 }
 0x4b1   : > { %v579_v28 = vsel %vm577_vm4, %v573_v27, 0  ;;  %1579 = vrcp.f32 %v682_v29  ;;  %v1558_v29 = vld [vmem:[%s2011_s8 + $0x8] sm:$0xff]  }
 0x4b2   : > { %1421 = vmatpush3.bf16.msra.mxu0 %v579_v28 }
 0x4b3   : > { %1432 = vmatprep.subr.bf16.mxu0 %v1651_v8 }
 0x4b7   : > { %v1578_v30 = vpop.eup %1577 }
 0x4b8   : > { %v570_v31 = vmul.f32 %v1578_v30, %v1570_v11  ;;  %v1559_v30 = vld [vmem:[%s2013_s10] sm:$0xff]  }
 0x4ba   : > { %v571_v32 = vpack.c.bf16 %v570_v31, %v570_v31  ;;  %v1560_v31 = vld [vmem:[%s2013_s10 + $0x8] sm:$0xff]  }
 0x4bb   : > { %v1580_v21 = vpop.eup %1579 }
 0x4bc   : > { %1423 = vmatmul.mubr.msk.bf16.vlgmr.msra.gmra.mrb[8].mxu0 %vm511_vm2, %v571_v32  ;;  %v684_v34 = vmul.f32 %v1580_v21, %v1572_v13  ;;  %v1561_v32 = vld [vmem:[%s2013_s10 + $0x10] sm:$0xff]   ;;  %v1562_v21 = vld [vmem:[%s2013_s10 + $0x18] sm:$0xff]  }
 0x4bd   : > { %1434 = vmatprep.mubr.msk.bf16.mxu0 %vm1652_vm1, %v1651_v8 }
 0x4be   : > { %v685_v37 = vpack.c.bf16 %v684_v34, %v684_v34  ;;  %v1564_v34 = vld [vmem:[%s2013_s10 + $0x28] sm:$0xff]  }
 0x4c0   : > { %v908_v33 = vpop.xlane.xlu0 %907 }
 0x4c4   : > { %v687_v35 = vpop.permute.xlu0 %686 }
 0x4c5   : > { %v692_v36 = vsel %vm577_vm4, %v687_v35, 0 }
 0x4c6   : > { %1433 = vmatpush3.bf16.msra.mxu0 %v692_v36 }
 0x4c7   : > { %1444 = vmatprep.subr.bf16.mxu0 %v1651_v8 }
 0x4c9   : > { %1435 = vmatmul.mubr.msk.bf16.vlgmr.msra.gmra.mrb[12].mxu0 %vm511_vm2, %v685_v37 }
 0x4ca   : > { %1446 = vmatprep.mubr.msk.bf16.mxu0 %vm1652_vm1, %v1651_v8 }
 0x4e1   : > { %v795_v38 = vpop.xlane.xlu1 %794 }
 0x4e2   : > { %1581 = vrcp.f32 %v795_v38 }
 0x4e3   : > { %1583 = vrcp.f32 %v908_v33  ;;  %v1563_v33 = vld [vmem:[%s2013_s10 + $0x20] sm:$0xff]  }
 0x4e5   : > { %v800_v39 = vpop.permute.xlu1 %799 }
 0x4e6   : > { %v805_v40 = vsel %vm577_vm4, %v800_v39, 0  ;;  %v1353_v39 = vld [vmem:[%s2009_s6] ss:$0 sm:$0xff] }
 0x4e7   : > { %1445 = vmatpush3.bf16.msra.mxu0 %v805_v40 }
 0x4e8   : > { %1456 = vmatprep.subr.bf16.mxu0 %v1651_v8 }
 0x4e9   : > { %v913_v43 = vpop.permute.xlu1 %912 }
 0x4ea   : > { %v918_v46 = vsel %vm577_vm4, %v913_v43, 0 }
 0x4ec   : > { %v1582_v41 = vpop.eup %1581 }
 0x4ed   : > { %v797_v42 = vmul.f32 %v1582_v41, %v1576_v24  ;;  %v1584_v45 = vpop.eup %1583  ;;  %v1354_v41 = vld [vmem:[%s2010_s7] ss:$0 sm:$0xff] }
 0x4ee   : > { %v910_v47 = vmul.f32 %v1584_v45, %v1574_v18  ;;  %v1565_v45 = vld [vmem:[%s2013_s10 + $0x30] sm:$0xff]  }
 0x4ef   : > { %v798_v44 = vpack.c.bf16 %v797_v42, %v797_v42 }
 0x4f0   : > { %v911_v48 = vpack.c.bf16 %v910_v47, %v910_v47  ;;  %v1355_v47 = vld [vmem:[%s2012_s9] ss:$0 sm:$0xff] }
 0x4f1   : > { %1447 = vmatmul.mubr.msk.bf16.vlgmr.msra.gmra.mrb[16].mxu0 %vm511_vm2, %v798_v44 }
 0x4f2   : > { %1457 = vmatpush3.bf16.msra.mxu0 %v918_v46  ;;  %1458 = vmatprep.mubr.msk.bf16.mxu0 %vm1652_vm1, %v1651_v8  ;;  %v1566_v46 = vld [vmem:[%s2013_s10 + $0x38] sm:$0xff]  }
 0x4f3   : > { %1470 = vmatprep.subr.bf16.mxu0 %v1651_v8 }
 0x4f9   : > { %1459 = vmatmul.mubr.msk.bf16.vlgmr.msra.gmra.mrb[20].mxu0 %vm511_vm2, %v911_v48 }
 0x4fa   : > { %1474 = vmatprep.mubr.msk.bf16.mxu0 %vm1652_vm1, %v1651_v8 }
 0x58f   : > { %v615_v49 = vpop.f32.mrb[8].mxu0 }
 0x590   : > { %v1424_v50 = vpop.f32.mrb[9].mxu0  ;;  %v621_v9 = vpack.c.bf16 %v615_v49, %v615_v49 }
 0x591   : > { %v618_v51 = vpop.f32.mrb[10].mxu0 }
 0x592   : > { %v1425_v52 = vpop.f32.mrb[11].mxu0 }
 0x59c   : > { %v728_v53 = vpop.f32.mrb[12].mxu0 }
 0x59d   : > { %v734_v54 = vpack.c.bf16 %v728_v53, %v728_v53  ;;  %v1436_v55 = vpop.f32.mrb[13].mxu0 }
 0x59e   : > { %v731_v56 = vpop.f32.mrb[14].mxu0 }
 0x59f   : > { %962 = vrot.lane.b32.xlu0 %v734_v54, %s1664_s26  ;;  %v1437_v57 = vpop.f32.mrb[15].mxu0  ;;  %s1334_s26 = sshll.u32 %s402_s20, 3 }
 0x5a0   : > { %s404_s16 = scalar_lea.vmem [#allocation2], %s1334_s26 }
 0x5c4   : > { %v841_v60 = vpop.f32.mrb[16].mxu0 }
 0x5c5   : > { %v847_v61 = vpack.c.bf16 %v841_v60, %v841_v60  ;;  %v1448_v62 = vpop.f32.mrb[17].mxu0 }
 0x5c6   : > { %v844_v63 = vpop.f32.mrb[18].mxu0 }
 0x5c7   : > { %965 = vrot.lane.b32.xlu1 %v847_v61, %s1665_s17  ;;  %v1449_v1 = vpop.f32.mrb[19].mxu0  ;;  %s1271_s17 = sshll.u32 %s404_s16, 4  ;;  %s1962_s17 = int_to_ptr.vmem [resolvable:$true] %s1271_s17 }
 0x5c8   : > { %s1587_s26 = scalar_lea.vmem %s1962_s17, 128  ;;  %p1594_p0 = scmp.lt.s32.totalorder %s1962_s17, %s1592_s29 }
 0x5c9   : > { %p1588_p11 = scmp.ne.s32.totalorder %s1962_s17, %s1587_s26  ;;  %p1595_p1 = scmp.lt.s32.totalorder %s1593_s1, %s1587_s26 }
 0x5cb   : > { %p1589_p12 = pnand %p1588_p11, %p1771_p5  ;;  %p1596_p2 = por %p1595_p1, %p1594_p0 }
 0x5cc   : > { %v954_v2 = vpop.f32.mrb[20].mxu0 }
 0x5cd   : > { %v960_v3 = vpack.c.bf16 %v954_v2, %v954_v2  ;;  %v1460_v4 = vpop.f32.mrb[21].mxu0  ;;  %p1590_p13 = pneg %p1589_p12 }
 0x5ce   : > { %v957_v5 = vpop.f32.mrb[22].mxu0 }
 0x5cf   : > { %968 = vrot.lane.b32.xlu0 %v960_v3, %s1666_s18  ;;  %v1461_v6 = vpop.f32.mrb[23].mxu0  ;;  %p1597_p3 = pnand %p1596_p2, %p1590_p13 }
 0x611   : > { %v963_v7 = vpop.permute.xlu0 %962 }
 0x612   : > { %v972_v11 = vsel %vm511_vm2, %v621_v9, %v963_v7 }
 0x639   : > { %v966_v10 = vpop.permute.xlu1 %965 }
 0x63a   : > { %v975_v12 = vsel %vm973_vm5, %v972_v11, %v966_v10 }
 0x641   : > { %v969_v13 = vpop.permute.xlu0 %968 }
 0x642   : > { %v978_v14 = vsel %vm976_vm6, %v975_v12, %v969_v13 }
 0x643   : > { %1467 = vmatmul.mubr.msk.bf16.vlgmr.msra.gmra.mrb[12].mxu1 %vm411_vm0, %v978_v14 }
 0x644   : > { %1494 = vmatprep.mubr.msk.bf16.mxu1 %vm1652_vm1, %v1651_v8  ;;  %1479 = vmatpush3.bf16.msra.mxu1 %v1559_v30 }
 0x645   : > { %1480 = vmatprep.subr.bf16.mxu1 %v1651_v8 }
 0x648   : > { %1481 = vmatpush3.bf16.msra.mxu1 %v1560_v31 }
 0x649   : > { %1482 = vmatprep.subr.bf16.mxu1 %v1651_v8 }
 0x64c   : > { %1483 = vmatpush3.bf16.msra.mxu1 %v1561_v32 }
 0x64d   : > { %1484 = vmatprep.subr.bf16.mxu1 %v1651_v8 }
 0x650   : > { %1485 = vmatpush3.bf16.msra.mxu1 %v1562_v21 }
 0x651   : > { %1486 = vmatprep.subr.bf16.mxu1 %v1651_v8 }
 0x654   : > { %1487 = vmatpush3.bf16.msra.mxu1 %v1563_v33 }
 0x655   : > { %1488 = vmatprep.subr.bf16.mxu1 %v1651_v8 }
 0x658   : > { %1489 = vmatpush3.bf16.msra.mxu1 %v1564_v34 }
 0x659   : > { %1490 = vmatprep.subr.bf16.mxu1 %v1651_v8 }
 0x65c   : > { %1491 = vmatpush3.bf16.msra.mxu1 %v1565_v45 }
 0x65d   : > { %1492 = vmatprep.subr.bf16.mxu1 %v1651_v8 }
 0x660   : > { %1493 = vmatpush3.bf16.msra.mxu1 %v1566_v46 }
 0x716   : > { %v1031_v15 = vpop.f32.mrb[12].mxu1 }
 0x717   : > { %v1037_v17 = vadd.f32 %v1031_v15, %v1786_v0  ;;  %v1468_v18 = vpop.f32.mrb[13].mxu1  ;;  %v1557_v0 = vld [vmem:[%s2011_s8] sm:$0xff]  }
 0x718   : > { %v1034_v19 = vpop.f32.mrb[14].mxu1  ;;  %1471 = vmatpush3.bf16.msra.mxu0 %v1557_v0 }
 0x719   : > { %v1897_v20 = vadd.f32 %v1352_v16, %v1037_v17  ;;  %v1469_v22 = vpop.f32.mrb[15].mxu1  ;;  %1472 = vmatprep.subr.bf16.mxu0 %v1651_v8  ;;  %v1359_v8 = vld [vmem:[%s2014_s11] ss:$0 sm:$0xff] }
 0x71b   : > { %v1046_v23 = vsel %vm411_vm0, %v1897_v20, 0.0 }
 0x71c   : > { %1047 = vadd.xlane.f32.xlu1 %v1046_v23  ;;  %1473 = vmatpush3.bf16.msra.mxu0 %v1558_v29 }
 0x7a9   : > { %v1048_v24 = vpop.xlane.xlu1 %1047 }
 0x7aa   : > { %v1049_v25 = vmul.f32 0.03125, %v1048_v24 }
 0x7ac   : > { %v1050_v26 = vsub.f32 %v1897_v20, %v1049_v25 }
 0x7ae   : > { %v1051_v27 = vmul.f32 %v1050_v26, %v1050_v26 }
 0x7b0   : > { %v1052_v28 = vsel %vm411_vm0, %v1051_v27, 0.0 }
 0x7b1   : > { %1053 = vadd.xlane.f32.xlu0 %v1052_v28 }
 0x83e   : > { %v1054_v35 = vpop.xlane.xlu0 %1053 }
 0x83f   : > { %v1055_v36 = vmul.f32 0.03125, %v1054_v35 }
 0x841   : > { %v1056_v37 = vadd.f32 1e-05, %v1055_v36 }
 0x843   : > { %1585 = vrsqrt.f32 %v1056_v37 }
 0x84d   : > { %v1586_v38 = vpop.eup %1585 }
 0x84e   : > { %v1058_v40 = vmul.f32 %v1586_v38, %v1050_v26 }
 0x850   : > { %v1066_v42 = vmul.f32 %v1353_v39, %v1058_v40 }
 0x852   : > { %v1074_v43 = vadd.f32 %v1354_v41, %v1066_v42 }
 0x854   : > { %v1075_v44 = vpack.c.bf16 %v1074_v43, %v1074_v43 }
 0x856   : > { %1475 = vmatmul.mubr.msk.bf16.vlgmr.msra.gmra.mrb[24].mxu0 %vm411_vm0, %v1075_v44 }
 0x929   : > { %v1136_v48 = vpop.f32.mrb[24].mxu0 }
 0x92a   : > { %v1137_v49 = vadd.f32 %v1355_v47, %v1136_v48  ;;  %v1476_v50 = vpop.f32.mrb[25].mxu0 }
 0x92b   : > { %v1139_v51 = vpop.f32.mrb[26].mxu0 }
 0x92c   : > { %v1142_v52 = vmax.f32 %v1137_v49, 0.0  ;;  %v1477_v53 = vpop.f32.mrb[27].mxu0 }
 0x92e   : > { %v1143_v54 = vpack.c.bf16 %v1142_v52, %v1142_v52 }
 0x930   : > { %1495 = vmatmul.mubr.bf16.vlgmr.msra.gmra.mrb[16].mxu1 %v1143_v54 }
 0xa03   : > { %v1249_v55 = vpop.f32.mrb[16].mxu1 }
 0xa04   : > { %v1250_v56 = vadd.f32 %v1359_v8, %v1249_v55  ;;  %v1496_v57 = vpop.f32.mrb[17].mxu1 }
 0xa05   : > { %v1252_v58 = vpop.f32.mrb[18].mxu1 }
 0xa06   : > { %v1255_v59 = vadd.f32 %v1250_v56, %v1897_v20  ;;  %v1497_v60 = vpop.f32.mrb[19].mxu1 }
 0xa08   : > { %1256 = vst.msk [vmem:[%s404_s16] sm:$0xff] %vm411_vm0, %v1255_v59 }
 0xa09   : > { %1600 = shalt.err (!%p1597_p3)
}
 0xa0a   : > { %s1601_s20 = scalar_lea.hbm %s1960_s0, 128  ;;  %s1605_s18 = scalar_lea.hbm %s2015_s12, 256 }
 0xa0b   : > { %p1602_p4 = scmp.ne.s32.totalorder %s1960_s0, %s1601_s20  ;;  %p1606_p9 = scmp.lt.u32.totalorder %s1960_s0, %s2015_s12 }
 0xa0c   : > { %p1607_p10 = scmp.lt.u32.totalorder %s1605_s18, %s1601_s20  ;;  %p1609_p12 = scmp.lt.u32.totalorder %s1601_s20, %s1960_s0 }
 0xa0d   : > { %p1603_p7 = pnand %p1602_p4, %p1771_p5 }
 0xa0e   : > { %p1608_p11 = por %p1607_p10, %p1606_p9 }
 0xa0f   : > { %p1604_p8 = pneg %p1603_p7 }
 0xa10   : > { %p1610_p13 = por %p1609_p12, %p1608_p11 }
 0xa12   : > { %p1611_p0 = pnand %p1610_p13, %p1604_p8 }
 0xa14   : > { %1614 = shalt.err (!%p1611_p0)
}
 0xa15   : > { %1498 = dma.vmem_to_hbm [thread:$0]  (%p1771_p5), %s1962_s17, 128, %s1960_s0, %s1258_s25  }
 0xa16 PF: > { %p1504_p1 = scmp.ge.s32.totalorder %s1649_s24, 2  ;;  %s1283_s1 = sand.u32 1, %s1637_s21  }
 0xa17   : > { %s1284_s26 = scalar_lea.sflag [#allocation3], %s1283_s1 }
 0xa18   : > { %p1501_p2 = pnand %p1504_p1, %p1775_p6 }
 0xa1a   : > { %1632 = dma.done.wait (!%p1501_p2), %s1284_s26, 128  }
 0xa1b   : > { %1634 = vsyncadd (!%p1501_p2), %s1284_s26, 4294967168  ;;  %p22_p3 = scmp.ge.s32.totalorder %s1758_s27, 4   ;;  %s2022_s21 = smov %s1641_s22 }
 0xa1c   : > { %s2023_s22 = smov %s1645_s23  ;;  %s2024_s23 = smov %s1769_s30 }
 0xa1d   : > { %s2025_s24 = smov %s1758_s27  ;;  %24 = sbr.rel (!%p22_p3) target bundleno = 6 (0x6), region = 103 }
 0xa24   :  { %1289 = vsyncpa [#allocation3], 1 }
 0xa25   :  { %1291 = vsyncpa [#allocation3 + $0x1], 1 }

</bundles_post_ra>
